<compile_context>
chip_gen: v6e
topology: v6e:2x2x1
jax: 0.10.0
libtpu: 0.0.40
codegen_flags: <defaults>
</compile_context>

<pallas_src>
import jax
import jax.numpy as jnp
from jax.experimental import pallas as pl
from jax.experimental.pallas import tpu as pltpu


def _round_up(x, m):
    return ((x + m - 1) // m) * m


def _pad_to(x, shape):
    """Zero-pad a 2D array up to `shape` (trailing pad only)."""
    pads = [(0, t - s) for s, t in zip(x.shape, shape)]
    if all(p == (0, 0) for p in pads):
        return x
    return jnp.pad(x, pads)


def _textmf_kernel(p_ref, q_ref, wproj_ref, bproj_ref, wcls_ref, bcls_ref, o_ref):
    # p_ref:     (TB, Dp)      model embeddings tile     (compute dtype)
    # q_ref:     (TB, Tp)      (possibly noised) question embeddings tile
    # wproj_ref: (Tp, Dp)      text_proj weight, transposed
    # bproj_ref: (1, Dp)       text_proj bias (f32)
    # wcls_ref:  (Dp, Cp)      classifier weight, transposed
    # bcls_ref:  (1, Cp)       classifier bias (f32)
    # o_ref:     (TB, Cp)      logits tile (f32)
    q_proj = jnp.dot(q_ref[...], wproj_ref[...], preferred_element_type=jnp.float32)
    q_proj = q_proj + bproj_ref[...]
    h = p_ref[...].astype(jnp.float32) * q_proj
    logits = jnp.dot(h.astype(wcls_ref.dtype), wcls_ref[...],
                     preferred_element_type=jnp.float32)
    o_ref[...] = (logits + bcls_ref[...]).astype(o_ref.dtype)


def textmf_logits_pallas(p, q, w_proj_t, b_proj, w_cls_t, b_cls,
                         *, tb=128, compute_dtype=jnp.float32):
    """classifier(p * text_proj(q)) with a single tiled Pallas kernel."""
    B, D = p.shape
    _, T = q.shape
    C = w_cls_t.shape[1]

    # Lane-dense padded dims.
    D_pad = _round_up(D, 128)
    T_pad = _round_up(T, 128)
    C_pad = _round_up(C, 128)

    # Batch tile: fixed (default 128) but never larger than the (8-aligned) batch.
    TB = min(tb, _round_up(B, 8))
    TB = _round_up(TB, 8)
    B_pad = _round_up(B, TB)
    grid = (B_pad // TB,)

    # Zero-pad + cast operands. Biases stay f32 (f32 accumulate path).
    p_p = _pad_to(p.astype(compute_dtype), (B_pad, D_pad))
    q_p = _pad_to(q.astype(compute_dtype), (B_pad, T_pad))
    wproj_p = _pad_to(w_proj_t.astype(compute_dtype), (T_pad, D_pad))
    bproj_p = _pad_to(b_proj.astype(jnp.float32), (1, D_pad))
    wcls_p = _pad_to(w_cls_t.astype(compute_dtype), (D_pad, C_pad))
    bcls_p = _pad_to(b_cls.astype(jnp.float32), (1, C_pad))

    out = pl.pallas_call(
        _textmf_kernel,
        out_shape=jax.ShapeDtypeStruct((B_pad, C_pad), jnp.float32),
        grid_spec=pltpu.PrefetchScalarGridSpec(
            num_scalar_prefetch=0,
            grid=grid,
            in_specs=[
                # Batch-tiled activations: double-buffered (default) so the DMA
                # of tile i+1 hides under compute of tile i.
                pl.BlockSpec((TB, D_pad), lambda i: (i, 0)),
                pl.BlockSpec((TB, T_pad), lambda i: (i, 0)),
                # Constant-index weights/biases: fetched once, single-buffered.
                pl.BlockSpec((T_pad, D_pad), lambda i: (0, 0),
                             pipeline_mode=pl.Buffered(1)),
                pl.BlockSpec((1, D_pad), lambda i: (0, 0),
                             pipeline_mode=pl.Buffered(1)),
                pl.BlockSpec((D_pad, C_pad), lambda i: (0, 0),
                             pipeline_mode=pl.Buffered(1)),
                pl.BlockSpec((1, C_pad), lambda i: (0, 0),
                             pipeline_mode=pl.Buffered(1)),
            ],
            out_specs=pl.BlockSpec((TB, C_pad), lambda i: (i, 0)),
        ),
        compiler_params=pltpu.CompilerParams(
            dimension_semantics=("parallel",),
        ),
    )(p_p, q_p, wproj_p, bproj_p, wcls_p, bcls_p)

    # Slice padded rows / padded classes back off.
    return out[:B, :C]


def textmf_forward(params, model_ids, prompt_ids, alpha, test_mode=False,
                   noise_key=None, compute_dtype=jnp.float32):
    # Embedding lookups (glue, plain JAX gathers).
    p = params["P"][model_ids]        # (B, model_dim)
    q = params["Q"][prompt_ids]       # (B, text_dim)
    if not test_mode:
        q = q + jax.random.normal(noise_key, q.shape, dtype=q.dtype) * alpha
    return textmf_logits_pallas(
        p, q,
        params["W_proj_t"], params["b_proj"],
        params["W_cls_t"], params["b_cls"],
        compute_dtype=compute_dtype,
    )


def textmf_predict(params, model_ids, prompt_ids):
    logits = textmf_forward(params, model_ids, prompt_ids, alpha=0.0, test_mode=True)
    return jnp.argmax(logits, axis=1)


def init_params(key, num_models, num_prompts, model_dim, text_dim, num_classes):
    """Deterministic synthetic parameter init (shapes match the PyTorch module)."""
    k = jax.random.split(key, 6)
    P = jax.random.normal(k[0], (num_models, model_dim), jnp.float32)          # nn.Embedding
    Q = jax.random.normal(k[1], (num_prompts, text_dim), jnp.float32)          # frozen question embeddings
    # nn.Linear(text_dim, model_dim): weight (model_dim, text_dim) -> store transposed
    W_proj = jax.random.normal(k[2], (model_dim, text_dim), jnp.float32) * (1.0 / jnp.sqrt(text_dim))
    b_proj = jax.random.normal(k[3], (1, model_dim), jnp.float32) * 0.01
    # nn.Linear(model_dim, num_classes): weight (num_classes, model_dim) -> store transposed
    W_cls = jax.random.normal(k[4], (num_classes, model_dim), jnp.float32) * (1.0 / jnp.sqrt(model_dim))
    b_cls = jax.random.normal(k[5], (1, num_classes), jnp.float32) * 0.01
    return {
        "P": P,
        "Q": Q,
        "W_proj_t": W_proj.T,   # (text_dim, model_dim)
        "b_proj": b_proj,       # (1, model_dim)
        "W_cls_t": W_cls.T,     # (model_dim, num_classes)
        "b_cls": b_cls,         # (1, num_classes)
    }


if __name__ == "__main__":
    # Small shapes consistent with the module's forward.
    num_models = 5
    num_prompts = 10
    model_dim = 64       # model_embedding_dim (padded to 128 lanes in the kernel)
    text_dim = 256       # (PyTorch default is 768; small here)
    num_classes = 2      # padded to 128 lanes in the kernel, sliced back
    batch = 200          # deliberately NOT a multiple of the 128-row tile
    alpha = 0.05

    root = jax.random.PRNGKey(0)
    k_param, k_model, k_prompt, k_noise = jax.random.split(root, 4)

    params = init_params(k_param, num_models, num_prompts, model_dim, text_dim, num_classes)
    model_ids = jax.random.randint(k_model, (batch,), 0, num_models)
    prompt_ids = jax.random.randint(k_prompt, (batch,), 0, num_prompts)

    # Training-mode forward (with Gaussian noise on q) via the Pallas kernel.
    logits_train = textmf_forward(params, model_ids, prompt_ids, alpha,
                                  test_mode=False, noise_key=k_noise)
    logits_train = jax.block_until_ready(logits_train)
    assert logits_train.shape == (batch, num_classes)

    # Test-mode forward + predict (argmax), f32 operands.
    logits_test = textmf_forward(params, model_ids, prompt_ids, alpha, test_mode=True)
    logits_test = jax.block_until_ready(logits_test)
    preds = jax.block_until_ready(textmf_predict(params, model_ids, prompt_ids))

    # Pure-JAX reference check (test mode is deterministic).
    p_ref = params["P"][model_ids]
    q_ref = params["Q"][prompt_ids] @ params["W_proj_t"] + params["b_proj"]
    ref = (p_ref * q_ref) @ params["W_cls_t"] + params["b_cls"]
    assert logits_test.shape == (batch, num_classes)
    assert preds.shape == (batch,)
    assert jnp.allclose(logits_test, ref, atol=1e-4, rtol=1e-4)

    # bf16-operand path (v6e/v7x MXU recommendation), f32 accumulate; loose check.
    logits_bf16 = textmf_forward(params, model_ids, prompt_ids, alpha,
                                 test_mode=True, compute_dtype=jnp.bfloat16)
    logits_bf16 = jax.block_until_ready(logits_bf16)
    assert logits_bf16.shape == (batch, num_classes)
    assert bool(jnp.all(jnp.isfinite(logits_bf16)))
    assert float(jnp.mean(jnp.abs(logits_bf16 - ref))) < 0.35

    print("KERNEL_OK")
</pallas_src>

<mosaic_0001>
module attributes {stable_mosaic.version = 11 : i64} {
  func.func @_textmf_kernel(%arg0: i32, %arg1: memref<128x128xf32, #tpu.memory_space<vmem>>, %arg2: memref<128x256xf32, #tpu.memory_space<vmem>>, %arg3: memref<256x128xf32, #tpu.memory_space<vmem>>, %arg4: memref<1x128xf32, #tpu.memory_space<vmem>>, %arg5: memref<128x128xf32, #tpu.memory_space<vmem>>, %arg6: memref<1x128xf32, #tpu.memory_space<vmem>>, %arg7: memref<128x128xf32, #tpu.memory_space<vmem>>) attributes {dimension_semantics = [#tpu.dimension_semantics<parallel>], iteration_bounds = array<i64: 2>, scalar_prefetch = 0 : i64, scratch_operands = 0 : i64, tpu.core_type = #tpu.core_type<tc>, window_params = [{transform_indices = @transform_0, window_bounds = array<i64: 128, 128>}, {transform_indices = @transform_1, window_bounds = array<i64: 128, 256>}, {pipeline_mode = #tpu.pipeline_mode<synchronous>, transform_indices = @transform_2, window_bounds = array<i64: 256, 128>}, {pipeline_mode = #tpu.pipeline_mode<synchronous>, transform_indices = @transform_3, window_bounds = array<i64: 1, 128>}, {pipeline_mode = #tpu.pipeline_mode<synchronous>, transform_indices = @transform_4, window_bounds = array<i64: 128, 128>}, {pipeline_mode = #tpu.pipeline_mode<synchronous>, transform_indices = @transform_5, window_bounds = array<i64: 1, 128>}, {transform_indices = @transform_6, window_bounds = array<i64: 128, 128>}]} {
    %c0 = arith.constant 0 : index
    %c0_0 = arith.constant 0 : index
    %0 = vector.load %arg2[%c0, %c0_0] : memref<128x256xf32, #tpu.memory_space<vmem>>, vector<128x256xf32>
    %c0_1 = arith.constant 0 : index
    %c0_2 = arith.constant 0 : index
    %1 = vector.load %arg3[%c0_1, %c0_2] : memref<256x128xf32, #tpu.memory_space<vmem>>, vector<256x128xf32>
    %cst = arith.constant dense<0.000000e+00> : vector<128x128xf32>
    %2 = tpu.matmul %0, %1, %cst {dimension_numbers = #tpu.dot_dimension_numbers<[1], [0], [0], [1], [0, 0, 1, 1], [], []>} : vector<128x256xf32>, vector<256x128xf32>, vector<128x128xf32> -> vector<128x128xf32>
    %c0_3 = arith.constant 0 : index
    %c0_4 = arith.constant 0 : index
    %3 = vector.load %arg4[%c0_3, %c0_4] : memref<1x128xf32, #tpu.memory_space<vmem>>, vector<1x128xf32>
    %4 = vector.broadcast %3 : vector<1x128xf32> to vector<128x128xf32>
    %5 = arith.addf %2, %4 : vector<128x128xf32>
    %c0_5 = arith.constant 0 : index
    %c0_6 = arith.constant 0 : index
    %6 = vector.load %arg1[%c0_5, %c0_6] : memref<128x128xf32, #tpu.memory_space<vmem>>, vector<128x128xf32>
    %7 = arith.mulf %6, %5 : vector<128x128xf32>
    %c0_7 = arith.constant 0 : index
    %c0_8 = arith.constant 0 : index
    %8 = vector.load %arg5[%c0_7, %c0_8] : memref<128x128xf32, #tpu.memory_space<vmem>>, vector<128x128xf32>
    %cst_9 = arith.constant dense<0.000000e+00> : vector<128x128xf32>
    %9 = tpu.matmul %7, %8, %cst_9 {dimension_numbers = #tpu.dot_dimension_numbers<[1], [0], [0], [1], [0, 0, 1, 1], [], []>} : vector<128x128xf32>, vector<128x128xf32>, vector<128x128xf32> -> vector<128x128xf32>
    %c0_10 = arith.constant 0 : index
    %c0_11 = arith.constant 0 : index
    %10 = vector.load %arg6[%c0_10, %c0_11] : memref<1x128xf32, #tpu.memory_space<vmem>>, vector<1x128xf32>
    %11 = vector.broadcast %10 : vector<1x128xf32> to vector<128x128xf32>
    %12 = arith.addf %9, %11 : vector<128x128xf32>
    %c0_12 = arith.constant 0 : index
    %c0_13 = arith.constant 0 : index
    %13 = vector.load %arg7[%c0_12, %c0_13] : memref<128x128xf32, #tpu.memory_space<vmem>>, vector<128x128xf32>
    tpu.vector_store %arg7[%c0_12, %c0_13], %12 {strides = array<i32>} : memref<128x128xf32, #tpu.memory_space<vmem>>, vector<128x128xf32>,
    return
  }
  func.func @transform_0(%arg0: i32) -> (i32, i32) {
    %c0_i32 = arith.constant 0 : i32
    %c0_i32_0 = arith.constant 0 : i32
    return %arg0, %c0_i32 : i32, i32
  }
  func.func @transform_1(%arg0: i32) -> (i32, i32) {
    %c0_i32 = arith.constant 0 : i32
    %c0_i32_0 = arith.constant 0 : i32
    return %arg0, %c0_i32 : i32, i32
  }
  func.func @transform_2(%arg0: i32) -> (i32, i32) {
    %c0_i32 = arith.constant 0 : i32
    %c0_i32_0 = arith.constant 0 : i32
    %c0_i32_1 = arith.constant 0 : i32
    return %c0_i32, %c0_i32_0 : i32, i32
  }
  func.func @transform_3(%arg0: i32) -> (i32, i32) {
    %c0_i32 = arith.constant 0 : i32
    %c0_i32_0 = arith.constant 0 : i32
    %c0_i32_1 = arith.constant 0 : i32
    return %c0_i32, %c0_i32_0 : i32, i32
  }
  func.func @transform_4(%arg0: i32) -> (i32, i32) {
    %c0_i32 = arith.constant 0 : i32
    %c0_i32_0 = arith.constant 0 : i32
    %c0_i32_1 = arith.constant 0 : i32
    return %c0_i32, %c0_i32_0 : i32, i32
  }
  func.func @transform_5(%arg0: i32) -> (i32, i32) {
    %c0_i32 = arith.constant 0 : i32
    %c0_i32_0 = arith.constant 0 : i32
    %c0_i32_1 = arith.constant 0 : i32
    return %c0_i32, %c0_i32_0 : i32, i32
  }
  func.func @transform_6(%arg0: i32) -> (i32, i32) {
    %c0_i32 = arith.constant 0 : i32
    %c0_i32_0 = arith.constant 0 : i32
    return %arg0, %c0_i32 : i32, i32
  }
}

</mosaic_0001>

<bundles_post_ra>
// kernel: tpu_custom_call.1
= control target key start
LH: loop header
LB: loop body
LE: loop exit
PB: predicated region body
PF: predicated region fallthrough
CT: control target
= control target key end

     0   :  { %s1765_s0 = inlined_call_operand.hbm [shape: f32[256,128], index: 0, kind: input, shape index: {}]   ;;  %s1766_s1 = inlined_call_operand.hbm [shape: f32[256,256], index: 1, kind: input, shape index: {}]   ;;  %s1767_s2 = inlined_call_operand.hbm [shape: f32[256,128], index: 2, kind: input, shape index: {}]   ;;  %s1768_s3 = inlined_call_operand.vmem [shape: f32[1,128], index: 3, kind: input, shape index: {}]   ;;  %s1769_s4 = inlined_call_operand.hbm [shape: f32[128,128], index: 4, kind: input, shape index: {}]   ;;  %s1770_s5 = inlined_call_operand.vmem [shape: f32[1,128], index: 5, kind: input, shape index: {}]   ;;  %s1771_s6 = inlined_call_operand.hbm [shape: f32[256,128], index: 6, kind: output, shape index: {}]  }
   0x1   :  { %1777 = sst [smem:[#allocation17_spill]] %s1765_s0 }
   0x2   :  { %1778 = sst [smem:[#allocation18_spill]] %s1767_s2 }
   0x3   :  { %1779 = sst [smem:[#allocation19_spill]] %s1769_s4 }
   0x4   :  { %11 = vsyncpa [#allocation3], 0 }
   0x5   :  { %13 = vsyncpa [#allocation3 + $0x1], 0 }
   0x6   :  { %14 = vsyncpa [#allocation6], 0 }
   0x7   :  { %16 = vsyncpa [#allocation6 + $0x1], 0 }
   0x8   :  { %17 = vsyncpa [#allocation9], 0 }
   0x9   :  { %18 = vsyncpa [#allocation4], 0 }
   0xa   :  { %20 = vsyncpa [#allocation4 + $0x1], 0  ;;  %s1411_s21 = smov 0   ;;  %s1413_s22 = smov 0  }
   0xb   :  { %s1415_s23 = smov 0   ;;  %s1417_s24 = smov 0  }
   0xc LB: > { %s1432_s25 = sadd.s32 4294967295, %s1363_s24   ;;  %s904_s26 = sadd.s32 4294967294, %s1363_s24   ;;  %s1363_s24 = sphi %s1417_s24, %s1806_s24   ;;  %s1359_s23 = sphi %s1415_s23, %s1805_s23   ;;  %s1355_s22 = sphi %s1413_s22, %s1804_s22   ;;  %s1351_s21 = sphi %s1411_s21, %s1803_s21  }
   0xd   : > { %p46_p0 = scmp.ne.s32.totalorder %s1355_s22, %s1351_s21  ;;  %p1774_p1 = scmp.eq.s32.totalorder %s1432_s25, 0 }
   0xe   : > { %p180_p2 = scmp.eq.s32.totalorder %s1432_s25, 1  ;;  %p186_p3 = scmp.eq.s32.totalorder %s904_s26, 1 }
   0xf   : > { %p1441_p4 = por %p1774_p1, %p46_p0  ;;  %p905_p5 = scmp.ge.s32.totalorder %s1363_s24, 1 }
  0x10   : > { %p1446_p6 = por %p186_p3, %p46_p0  ;;  %p193_p7 = scmp.lt.s32.totalorder %s1363_s24, 3 }
  0x11   : > { %s1780_s27 = scalar_select %p1441_p4, 1, 0 }
  0x12   : > { %s1781_s28 = scalar_select %p1446_p6, 1, 0 }
  0x13   : > { %p1451_p8 = pnand %p905_p5, %p193_p7  ;;  %s1365_s30 = smov [#allocation7]  }
  0x14   : > { %s205_s7 = sshll.u32 %s1365_s30, 4  ;;  %s1366_s9 = smov [#allocation8]   ;;  %s206_s7 = int_to_ptr.vmem [resolvable:$true] %s205_s7 }
  0x15   : > { %p1115_p9 = pneg %p1451_p8  ;;  %s221_s10 = sshll.u32 %s1366_s9, 4  ;;  %s222_s10 = int_to_ptr.vmem [resolvable:$true] %s221_s10 }
  0x16   : > { %s1190_s11 = scalar_lea.vmem %s206_s7, 4096  ;;  %p1198_p5 = scmp.lt.s32.totalorder %s206_s7, %s206_s7 }
  0x17   : > { %p1460_p11 = pnand %p1115_p9, %p1774_p1  ;;  %p1191_p13 = scmp.ne.s32.totalorder %s206_s7, %s1190_s11 }
  0x18   : > { %p1199_p7 = scmp.lt.s32.totalorder %s1190_s11, %s1190_s11 }
  0x19   : > { %p1181_p12 = pneg %p1460_p11 }
  0x1a   : > { %p1200_p10 = por %p1199_p7, %p1198_p5 }
  0x1b   : > { %p1193_p0 = pnand %p1191_p13, %p1181_p12 }
  0x1d   : > { %p1194_p3 = pneg %p1193_p0 }
  0x1f   : > { %p1201_p9 = pnand %p1200_p10, %p1194_p3 }
  0x21   : > { %1204 = shalt.err (!%p1201_p9)
}
  0x22   : > { %s1772_s12 = smov 128   ;;  %s1773_s13 = smov 8  }
  0x23   : > { %s1784_s2 = sld [smem:[#allocation18_spill]]  ;;  %s1216_s16 = scalar_lea.vmem %s222_s10, 2048 }
  0x24   : > { %p1217_p13 = scmp.ne.s32.totalorder %s222_s10, %s1216_s16  ;;  %p1224_p10 = scmp.lt.s32.totalorder %s222_s10, %s222_s10 }
  0x25   : > { %p1225_p3 = scmp.lt.s32.totalorder %s1216_s16, %s1216_s16 }
  0x26   : > { %p1219_p0 = pnand %p1217_p13, %p1181_p12 }
  0x27   : > { %p1226_p7 = por %p1225_p3, %p1224_p10 }
  0x28   : > { %p1220_p5 = pneg %p1219_p0 }
  0x29   : > { %1118 = dma.hbm_to_vmem [thread:$0]  (!%p1460_p11), %s1784_s2, 4096, %s206_s7, [#allocation6], %s1772_s12, %s1772_s12, %s1773_s13  }
  0x2a   : > { %p1227_p9 = pnand %p1226_p7, %p1220_p5 }
  0x2c   : > { %1230 = shalt.err (!%p1227_p9)
}
  0x2d   : > { %s1785_s4 = sld [smem:[#allocation19_spill]]  ;;  %s1489_s19 = sadd.s32 1, %s1363_s24  }
  0x2e   : > { %s33_s20 = sadd.s32 1, %s1359_s23  ;;  %s30_s26 = ssub.s32 %s1363_s24, %s1489_s19 }
  0x2f   : > { %p40_p12 = scmp.ne.s32.totalorder %s1359_s23, %s1355_s22  ;;  %p31_p13 = scmp.eq.s32.totalorder %s30_s26, 0 }
  0x30   : > { %p41_p0 = scmp.eq.s32.totalorder %s1363_s24, 0  ;;  %p1135_p10 = scmp.lt.s32.totalorder %s1363_s24, 2 }
  0x31   : > { %p1499_p5 = por %p180_p2, %p40_p12  ;;  %s1508_s8 = sand.u32 1, %s1359_s23  }
  0x32   : > { %s1505_s7 = scalar_select %p31_p13, %s1359_s23, %s33_s20  }
  0x33   : > { %1121 = dma.hbm_to_vmem [thread:$0]  (!%p1460_p11), %s1785_s4, 2048, %s222_s10, [#allocation9], %s1772_s12, %s1772_s12, %s1773_s13  }
  0x34   : > { %s1786_s30 = scalar_select %p1499_p5, 1, 0 }
  0x35   : > { %1787 = sst [smem:[#allocation16_spill]] %s1505_s7  ;;  %p42_p3 = por %p41_p0, %p40_p12 }
  0x36   : > { %s909_s9 = sshll.u32 %s1508_s8, 7  ;;  %s929_s10 = sshll.u32 %s1363_s24, 11 }
  0x37   : > { %s1788_s0 = sld [smem:[#allocation17_spill]]  ;;  %s242_s16 = scalar_lea.vmem [#allocation2], %s909_s9 }
  0x38   : > { %s249_s17 = sshll.u32 %s242_s16, 4  ;;  %p1519_p2 = pnand %p1135_p10, %p42_p3  ;;  %s1517_s17 = int_to_ptr.vmem [resolvable:$true] %s249_s17 }
  0x39   : > { %s239_s12 = scalar_lea.sflag [#allocation3], %s1508_s8 }
  0x3a   : > { %p1233_p7 = pneg %p1519_p2 }
  0x3d   : > { %s1515_s15 = scalar_lea.hbm %s1788_s0, %s929_s10  ;;  %s1236_s11 = scalar_lea.hbm %s1788_s0, 4096 }
  0x3e   : > { %s1231_s13 = scalar_lea.hbm %s1515_s15, 2048  ;;  %p1237_p13 = scmp.lt.s32.totalorder %s1515_s15, %s1788_s0 }
  0x3f   : > { %p1232_p11 = scmp.ne.s32.totalorder %s1515_s15, %s1231_s13  ;;  %p1238_p0 = scmp.lt.s32.totalorder %s1236_s11, %s1231_s13 }
  0x41   : > { %p1234_p9 = pnand %p1233_p7, %p1232_p11  ;;  %p1239_p10 = por %p1238_p0, %p1237_p13 }
  0x43   : > { %p1235_p12 = pneg %p1234_p9 }
  0x45   : > { %p1240_p3 = pnand %p1239_p10, %p1235_p12 }
  0x47   : > { %1243 = shalt.err (!%p1240_p3)
}
  0x48   : > { %s1244_s20 = scalar_lea.vmem %s1517_s17, 2048  ;;  %s1369_s9 = smov [#allocation2]  }
  0x49   : > { %p1245_p1 = scmp.ne.s32.totalorder %s1517_s17, %s1244_s20  ;;  %s1249_s10 = sshll.u32 %s1369_s9, 4  ;;  %s1250_s10 = int_to_ptr.vmem [resolvable:$false] %s1249_s10 }
  0x4a   : > { %s1251_s26 = scalar_lea.vmem %s1250_s10, 4096  ;;  %p1252_p6 = scmp.lt.s32.totalorder %s1517_s17, %s1250_s10 }
  0x4b   : > { %p1247_p11 = pnand %p1245_p1, %p1233_p7  ;;  %p1253_p5 = scmp.lt.s32.totalorder %s1251_s26, %s1244_s20 }
  0x4d   : > { %p1248_p9 = pneg %p1247_p11  ;;  %p1254_p4 = por %p1253_p5, %p1252_p6 }
  0x4f   : > { %p1255_p13 = pnand %p1254_p4, %p1248_p9 }
  0x51   : > { %1258 = shalt.err (!%p1255_p13)
}
  0x52   : > { %s1790_s13 = smov 8   ;;  %s1791_s11 = smov 128  }
  0x53   : > { %1125 = dma.hbm_to_vmem [thread:$0]  (!%p1519_p2), %s1515_s15, 2048, %s1517_s17, %s239_s12, %s1791_s11, %s1791_s11, %s1790_s13  }
  0x54   : > { %s931_s14 = sshll.u32 %s1363_s24, 12  ;;  %s1792_s9 = sshll.u32 %s1508_s8, 8 }
  0x55   : > { %s1559_s26 = scalar_lea.hbm %s1766_s1, %s931_s14  ;;  %s263_s10 = scalar_lea.vmem [#allocation5], %s1792_s9 }
  0x56   : > { %s271_s0 = sshll.u32 %s263_s10, 4  ;;  %s1793_s2 = sand.u32 1, %s1363_s24   ;;  %s1563_s0 = int_to_ptr.vmem [resolvable:$true] %s271_s0 }
  0x57   : > { %s1567_s4 = scalar_lea.sflag [#allocation6], %s1793_s2  ;;  %s1259_s7 = scalar_lea.hbm %s1559_s26, 4096 }
  0x58   : > { %p1260_p1 = scmp.ne.s32.totalorder %s1559_s26, %s1259_s7  ;;  %s1264_s8 = scalar_lea.hbm %s1766_s1, 8192 }
  0x59   : > { %p1265_p5 = scmp.lt.s32.totalorder %s1559_s26, %s1766_s1  ;;  %p1266_p12 = scmp.lt.s32.totalorder %s1264_s8, %s1259_s7 }
  0x5a   : > { %p1262_p4 = pnand %p1260_p1, %p1233_p7 }
  0x5b   : > { %p1267_p0 = por %p1266_p12, %p1265_p5 }
  0x5c   : > { %p1263_p6 = pneg %p1262_p4 }
  0x5e   : > { %p1268_p10 = pnand %p1267_p0, %p1263_p6 }
  0x60   : > { %1271 = shalt.err (!%p1268_p10)
}
  0x61   : > { %s1272_s2 = scalar_lea.vmem %s1563_s0, 4096  ;;  %s1370_s11 = smov [#allocation5]  }
  0x62   : > { %p1273_p3 = scmp.ne.s32.totalorder %s1563_s0, %s1272_s2  ;;  %s1277_s14 = sshll.u32 %s1370_s11, 4  ;;  %s1278_s14 = int_to_ptr.vmem [resolvable:$false] %s1277_s14 }
  0x63   : > { %s1279_s16 = scalar_lea.vmem %s1278_s14, 8192  ;;  %p1280_p13 = scmp.lt.s32.totalorder %s1563_s0, %s1278_s14 }
  0x64   : > { %p1275_p11 = pnand %p1273_p3, %p1233_p7  ;;  %p1281_p1 = scmp.lt.s32.totalorder %s1279_s16, %s1272_s2 }
  0x66   : > { %p1276_p9 = pneg %p1275_p11  ;;  %p1282_p4 = por %p1281_p1, %p1280_p13 }
  0x68   : > { %p1283_p5 = pnand %p1282_p4, %p1276_p9 }
  0x6a   : > { %1286 = shalt.err (!%p1283_p5)
}
  0x6b   : > { %s1371_s7 = smov 256   ;;  %s1372_s20 = smov 16  }
  0x6c   : > { %1128 = dma.hbm_to_vmem [thread:$0]  (!%p1519_p2), %s1559_s26, 4096, %s1563_s0, %s1567_s4, %s1371_s7, %s1371_s7, %s1372_s20  }
  0x6d   : > { %283 = sbr.rel (%p1451_p8) target bundleno = 630 (0x276), region = 44  ;;  %s1595_s9 = sand.u32 (!%p1451_p8), 1, %s1355_s22  }
  0x6e   : > { %s917_s10 = sshll.u32 (!%p1451_p8), %s1595_s9, 7  ;;  %s286_s12 = scalar_lea.sflag (!%p1451_p8), [#allocation3], %s1595_s9 }
  0x6f   : > { %s1601_s15 = scalar_lea.vmem (!%p1451_p8), [#allocation2], %s917_s10  ;;  %p1794_p7 = scmp.ne.s32.totalorder (!%p1451_p8), %s1780_s27, 0 }
  0x72   : > { %1330 = dma.done.wait (%p1794_p7), %s286_s12, 2048  }
  0x73   : > { %1332 = vsyncadd (%p1794_p7), %s286_s12, 4294965248  ;;  %s294_s0 = sand.u32 1, %s1432_s25   ;;  %s918_s4 = sshll.u32 %s1595_s9, 8 }
  0x74   : > { %s295_s29 = scalar_lea.sflag [#allocation6], %s294_s0  ;;  %s1609_s18 = scalar_lea.vmem [#allocation5], %s918_s4 }
  0x75   : > { %1334 = dma.done.wait (%p1794_p7), %s295_s29, 4096  }
  0x76   : > { %1336 = vsyncadd (%p1794_p7), %s295_s29, 4294963200  ;;  %p1795_p8 = scmp.eq.s32.totalorder %s1432_s25, 0 }
  0x78   : > { %1338 = dma.done.wait (%p1795_p8), [#allocation6], 4096   ;;  %p1796_p2 = pmov %p1795_p8 }
  0x7a   : > { %1340 = vsyncadd (%p1796_p2), [#allocation6], 4294963200  ;;  %p1797_p6 = pmov %p1796_p2 }
  0x7b   : > { %p1798_p12 = pmov %p1796_p2 }
  0x7c   : > { %1342 = dma.done.wait (%p1797_p6), [#allocation9], 2048  }
  0x7d   : > { %1344 = vsyncadd (%p1798_p12), [#allocation9], 4294965248  ;;  %v406_v0 = vld [vmem:[#allocation7 + $0xf8] sm:$0xff]  ;;  %v405_v2 = vld [vmem:[#allocation7 + $0xf0] sm:$0xff]  ;;  %s1697_s13 = scalar_lea.vmem [#allocation10], %s917_s10  ;;  %s932_s2 = sshll.u32 %s1432_s25, 11 }
  0x7e   : > { %v390_v1 = vld [vmem:[#allocation7 + $0x78] sm:$0xff]  ;;  %933 = vmatprep.subr.mxu0 %v406_v0  ;;  %v389_v3 = vld [vmem:[#allocation7 + $0x70] sm:$0xff]  ;;  %v404_v4 = vld [vmem:[#allocation7 + $0xe8] sm:$0xff]  ;;  %s789_s11 = sshll.u32 %s1697_s13, 4  ;;  %s1718_s7 = scalar_lea.hbm %s1771_s6, %s932_s2  ;;  %s1720_s11 = int_to_ptr.vmem [resolvable:$true] %s789_s11 }
  0x7f   : > { %934 = vmatpush3.msra.mxu0 %v390_v1  ;;  %v388_v5 = vld [vmem:[#allocation7 + $0x68] sm:$0xff]  ;;  %v403_v6 = vld [vmem:[#allocation7 + $0xe0] sm:$0xff]  ;;  %v402_v8 = vld [vmem:[#allocation7 + $0xd8] sm:$0xff]  ;;  %s776_s20 = scalar_lea.sflag [#allocation4], %s1595_s9  ;;  %s1287_s10 = scalar_lea.vmem %s1720_s11, 2048 }
  0x80   : > { %935 = vmatprep.subr.mxu0 %v405_v2  ;;  %v387_v7 = vld [vmem:[#allocation7 + $0x60] sm:$0xff]  ;;  %v386_v9 = vld [vmem:[#allocation7 + $0x58] sm:$0xff]  ;;  %v401_v10 = vld [vmem:[#allocation7 + $0xd0] sm:$0xff]  ;;  %p1288_p0 = scmp.ne.s32.totalorder %s1720_s11, %s1287_s10  ;;  %p1799_p10 = scmp.ne.s32.totalorder %s1786_s30, 0 }
  0x81   : > { %936 = vmatpush3.msra.mxu0 %v389_v3  ;;  %v385_v11 = vld [vmem:[#allocation7 + $0x50] sm:$0xff]  ;;  %v400_v12 = vld [vmem:[#allocation7 + $0xc8] sm:$0xff]  ;;  %v399_v15 = vld [vmem:[#allocation7 + $0xc0] sm:$0xff]  ;;  %s1373_s25 = smov [#allocation10]  }
  0x82   : > { %937 = vmatprep.subr.mxu0 %v404_v4  ;;  %v344_v13 = vld [vmem:[%s1609_s18 + $0x8] sm:$0xff]  ;;  %v383_v16 = vld [vmem:[#allocation7 + $0x40] sm:$0xff]  ;;  %v398_v17 = vld [vmem:[#allocation7 + $0xb8] sm:$0xff]  ;;  %p1289_p3 = pnand %p1288_p0, %p1799_p10  ;;  %s1291_s12 = sshll.u32 %s1373_s25, 4  ;;  %s1292_s12 = int_to_ptr.vmem [resolvable:$false] %s1291_s12 }
  0x83   : > { %938 = vmatpush3.msra.mxu0 %v388_v5  ;;  %v384_v14 = vld [vmem:[#allocation7 + $0x48] sm:$0xff]  ;;  %478 = vmatprep.mubr.f32.mxu0 %v344_v13  ;;  %v382_v18 = vld [vmem:[#allocation7 + $0x38] sm:$0xff]  ;;  %v397_v19 = vld [vmem:[#allocation7 + $0xb0] sm:$0xff]  ;;  %p1294_p9 = scmp.lt.s32.totalorder %s1720_s11, %s1292_s12 }
  0x84   : > { %939 = vmatprep.subr.mxu0 %v403_v6  ;;  %v381_v20 = vld [vmem:[#allocation7 + $0x30] sm:$0xff]  ;;  %v396_v21 = vld [vmem:[#allocation7 + $0xa8] sm:$0xff]  ;;  %v395_v23 = vld [vmem:[#allocation7 + $0xa0] sm:$0xff]  ;;  %p1290_p11 = pneg %p1289_p3 }
  0x85   : > { %940 = vmatpush3.msra.mxu0 %v387_v7  ;;  %v380_v22 = vld [vmem:[#allocation7 + $0x28] sm:$0xff]  ;;  %v379_v24 = vld [vmem:[#allocation7 + $0x20] sm:$0xff]  ;;  %v606_v25 = vld [vmem:[#allocation8 + $0x78] sm:$0xff] }
  0x86   : > { %941 = vmatprep.subr.mxu0 %v402_v8  ;;  %v605_v26 = vld [vmem:[#allocation8 + $0x70] sm:$0xff]  ;;  %v394_v27 = vld [vmem:[#allocation7 + $0x98] sm:$0xff]  ;;  %1045 = vmatprep.subr.mxu1 %v606_v25  ;;  %v604_v29 = vld [vmem:[#allocation8 + $0x68] sm:$0xff] }
  0x87   : > { %942 = vmatpush3.msra.mxu0 %v386_v9  ;;  %v378_v28 = vld [vmem:[#allocation7 + $0x18] sm:$0xff]  ;;  %1046 = vmatpush3.msra.mxu1 %v606_v25  ;;  %v393_v30 = vld [vmem:[#allocation7 + $0x90] sm:$0xff]  ;;  %v603_v32 = vld [vmem:[#allocation8 + $0x60] sm:$0xff] }
  0x88   : > { %943 = vmatprep.subr.mxu0 %v401_v10  ;;  %1047 = vmatprep.subr.mxu1 %v605_v26  ;;  %v377_v31 = vld [vmem:[#allocation7 + $0x10] sm:$0xff]  ;;  %v392_v33 = vld [vmem:[#allocation7 + $0x88] sm:$0xff]  ;;  %v602_v35 = vld [vmem:[#allocation8 + $0x58] sm:$0xff] }
  0x89   : > { %944 = vmatpush3.msra.mxu0 %v385_v11  ;;  %1048 = vmatpush3.msra.mxu1 %v605_v26  ;;  %v376_v34 = vld [vmem:[#allocation7 + $0x8] sm:$0xff]  ;;  %v391_v36 = vld [vmem:[#allocation7 + $0x80] sm:$0xff]  ;;  %v601_v38 = vld [vmem:[#allocation8 + $0x50] sm:$0xff] }
  0x8a   : > { %945 = vmatprep.subr.mxu0 %v400_v12  ;;  %1049 = vmatprep.subr.mxu1 %v604_v29  ;;  %v375_v37 = vld [vmem:[#allocation7] sm:$0xff]  ;;  %v346_v40 = vld [vmem:[%s1609_s18 + $0x18] sm:$0xff]  ;;  %v600_v41 = vld [vmem:[#allocation8 + $0x48] sm:$0xff] }
  0x8b   : > { %946 = vmatpush3.msra.mxu0 %v384_v14  ;;  %1050 = vmatpush3.msra.mxu1 %v604_v29  ;;  %v343_v39 = vld [vmem:[%s1609_s18] sm:$0xff]  ;;  %v345_v43 = vld [vmem:[%s1609_s18 + $0x10] sm:$0xff]  ;;  %v348_v44 = vld [vmem:[%s1609_s18 + $0x28] sm:$0xff] }
  0x8c   : > { %947 = vmatprep.subr.mxu0 %v399_v15  ;;  %1051 = vmatprep.subr.mxu1 %v603_v32  ;;  %v599_v42 = vld [vmem:[#allocation8 + $0x40] sm:$0xff]  ;;  %v598_v45 = vld [vmem:[#allocation8 + $0x38] sm:$0xff]  ;;  %v597_v46 = vld [vmem:[#allocation8 + $0x30] sm:$0xff] }
  0x8d   : > { %948 = vmatpush3.msra.mxu0 %v383_v16  ;;  %1052 = vmatpush3.msra.mxu1 %v603_v32  ;;  %v347_v47 = vld [vmem:[%s1609_s18 + $0x20] sm:$0xff]  ;;  %v350_v48 = vld [vmem:[%s1609_s18 + $0x38] sm:$0xff]  ;;  %v349_v49 = vld [vmem:[%s1609_s18 + $0x30] sm:$0xff] }
  0x8e   : > { %949 = vmatprep.subr.mxu0 %v398_v17  ;;  %1053 = vmatprep.subr.mxu1 %v602_v35  ;;  %v352_v50 = vld [vmem:[%s1609_s18 + $0x48] sm:$0xff]  ;;  %v351_v51 = vld [vmem:[%s1609_s18 + $0x40] sm:$0xff]  ;;  %v354_v52 = vld [vmem:[%s1609_s18 + $0x58] sm:$0xff] }
  0x8f   : > { %950 = vmatpush3.msra.mxu0 %v382_v18  ;;  %1054 = vmatpush3.msra.mxu1 %v602_v35  ;;  %v353_v53 = vld [vmem:[%s1609_s18 + $0x50] sm:$0xff]  ;;  %v356_v54 = vld [vmem:[%s1609_s18 + $0x68] sm:$0xff]  ;;  %v355_v55 = vld [vmem:[%s1609_s18 + $0x60] sm:$0xff] }
  0x90   : > { %951 = vmatprep.subr.mxu0 %v397_v19  ;;  %1055 = vmatprep.subr.mxu1 %v601_v38  ;;  %v358_v56 = vld [vmem:[%s1609_s18 + $0x78] sm:$0xff]  ;;  %v357_v57 = vld [vmem:[%s1609_s18 + $0x70] sm:$0xff]  ;;  %v360_v58 = vld [vmem:[%s1609_s18 + $0x88] sm:$0xff] }
  0x91   : > { %952 = vmatpush3.msra.mxu0 %v381_v20  ;;  %1056 = vmatpush3.msra.mxu1 %v601_v38  ;;  %v359_v59 = vld [vmem:[%s1609_s18 + $0x80] sm:$0xff]  ;;  %v362_v60 = vld [vmem:[%s1609_s18 + $0x98] sm:$0xff]  ;;  %v361_v61 = vld [vmem:[%s1609_s18 + $0x90] sm:$0xff] }
  0x92   : > { %953 = vmatprep.subr.mxu0 %v396_v21  ;;  %1057 = vmatprep.subr.mxu1 %v600_v41  ;;  %v364_v62 = vld [vmem:[%s1609_s18 + $0xa8] sm:$0xff]  ;;  %v363_v63 = vld [vmem:[%s1609_s18 + $0xa0] sm:$0xff]  ;;  %v366_v0 = vld [vmem:[%s1609_s18 + $0xb8] sm:$0xff] }
  0x93   : > { %954 = vmatpush3.msra.mxu0 %v380_v22  ;;  %1058 = vmatpush3.msra.mxu1 %v600_v41  ;;  %v365_v1 = vld [vmem:[%s1609_s18 + $0xb0] sm:$0xff]  ;;  %v368_v2 = vld [vmem:[%s1609_s18 + $0xc8] sm:$0xff]  ;;  %v367_v3 = vld [vmem:[%s1609_s18 + $0xc0] sm:$0xff] }
  0x94   : > { %955 = vmatprep.subr.mxu0 %v395_v23  ;;  %1059 = vmatprep.subr.mxu1 %v599_v42  ;;  %v370_v4 = vld [vmem:[%s1609_s18 + $0xd8] sm:$0xff]  ;;  %v369_v5 = vld [vmem:[%s1609_s18 + $0xd0] sm:$0xff]  ;;  %v372_v6 = vld [vmem:[%s1609_s18 + $0xe8] sm:$0xff] }
  0x95   : > { %956 = vmatpush3.msra.mxu0 %v379_v24  ;;  %1060 = vmatpush3.msra.mxu1 %v599_v42  ;;  %v371_v7 = vld [vmem:[%s1609_s18 + $0xe0] sm:$0xff]  ;;  %v374_v8 = vld [vmem:[%s1609_s18 + $0xf8] sm:$0xff]  ;;  %v373_v9 = vld [vmem:[%s1609_s18 + $0xf0] sm:$0xff] }
  0x96   : > { %957 = vmatprep.subr.mxu0 %v394_v27  ;;  %1061 = vmatprep.subr.mxu1 %v598_v45  ;;  %v596_v10 = vld [vmem:[#allocation8 + $0x28] sm:$0xff]  ;;  %v595_v11 = vld [vmem:[#allocation8 + $0x20] sm:$0xff]  ;;  %v594_v12 = vld [vmem:[#allocation8 + $0x18] sm:$0xff] }
  0x97   : > { %958 = vmatpush3.msra.mxu0 %v378_v28  ;;  %1062 = vmatpush3.msra.mxu1 %v598_v45  ;;  %v593_v13 = vld [vmem:[#allocation8 + $0x10] sm:$0xff]  ;;  %v592_v14 = vld [vmem:[#allocation8 + $0x8] sm:$0xff]  ;;  %v591_v15 = vld [vmem:[#allocation8] sm:$0xff] }
  0x98   : > { %959 = vmatprep.subr.mxu0 %v393_v30  ;;  %1063 = vmatprep.subr.mxu1 %v597_v46  ;;  %v1658_v18 = vld [vmem:[%s1768_s3] ss:$0 sm:$0xff]  ;;  %v560_v27 = vld [vmem:[%s1601_s15 + $0x8] sm:$0xff] }
  0x99   : > { %960 = vmatpush3.msra.mxu0 %v377_v31  ;;  %1064 = vmatpush3.msra.mxu1 %v597_v46  ;;  %v559_v21 = vld [vmem:[%s1601_s15] sm:$0xff] }
  0x9a   : > { %961 = vmatprep.subr.mxu0 %v392_v33  ;;  %1065 = vmatprep.subr.mxu1 %v596_v10  ;;  %v561_v33 = vld [vmem:[%s1601_s15 + $0x10] sm:$0xff]  ;;  %v563_v45 = vld [vmem:[%s1601_s15 + $0x20] sm:$0xff] }
  0x9b   : > { %962 = vmatpush3.msra.mxu0 %v376_v34  ;;  %1066 = vmatpush3.msra.mxu1 %v596_v10 }
  0x9c   : > { %963 = vmatprep.subr.mxu0 %v391_v36  ;;  %1067 = vmatprep.subr.mxu1 %v595_v11 }
  0x9d   : > { %964 = vmatpush3.msra.mxu0 %v375_v37  ;;  %1068 = vmatpush3.msra.mxu1 %v595_v11  ;;  %v568_v11 = vld [vmem:[%s1601_s15 + $0x48] sm:$0xff] }
  0x9e   : > { %479 = vmatmul.mubr.f32.vlgmr.msra.gmra.mxu0 %v343_v39  ;;  %1069 = vmatprep.subr.mxu1 %v594_v12  ;;  %v562_v39 = vld [vmem:[%s1601_s15 + $0x18] sm:$0xff] }
  0x9f   : > { %483 = vmatprep.mubr.f32.mxu0 %v346_v40  ;;  %1070 = vmatpush3.msra.mxu1 %v594_v12 }
  0xa0   : > { %1071 = vmatprep.subr.mxu1 %v593_v13 }
  0xa1   : > { %1072 = vmatpush3.msra.mxu1 %v593_v13 }
  0xa2   : > { %484 = vmatmul.mubr.f32.gmra.mxu0 %v345_v43  ;;  %1073 = vmatprep.subr.mxu1 %v592_v14 }
  0xa3   : > { %488 = vmatprep.mubr.f32.mxu0 %v348_v44  ;;  %1074 = vmatpush3.msra.mxu1 %v592_v14 }
  0xa4   : > { %1075 = vmatprep.subr.mxu1 %v591_v15 }
  0xa5   : > { %1076 = vmatpush3.msra.mxu1 %v591_v15 }
  0xa6   : > { %489 = vmatmul.mubr.f32.gmra.mxu0 %v347_v47 }
  0xa7   : > { %493 = vmatprep.mubr.f32.mxu0 %v350_v48 }
  0xaa   : > { %494 = vmatmul.mubr.f32.gmra.mxu0 %v349_v49 }
  0xab   : > { %498 = vmatprep.mubr.f32.mxu0 %v352_v50 }
  0xae   : > { %499 = vmatmul.mubr.f32.gmra.mxu0 %v351_v51  ;;  %v564_v51 = vld [vmem:[%s1601_s15 + $0x28] sm:$0xff] }
  0xaf   : > { %503 = vmatprep.mubr.f32.mxu0 %v354_v52 }
  0xb2   : > { %504 = vmatmul.mubr.f32.gmra.mxu0 %v353_v53 }
  0xb3   : > { %508 = vmatprep.mubr.f32.mxu0 %v356_v54 }
  0xb6   : > { %509 = vmatmul.mubr.f32.gmra.mxu0 %v355_v55 }
  0xb7   : > { %513 = vmatprep.mubr.f32.mxu0 %v358_v56 }
  0xba   : > { %514 = vmatmul.mubr.f32.gmra.mxu0 %v357_v57  ;;  %v565_v57 = vld [vmem:[%s1601_s15 + $0x30] sm:$0xff] }
  0xbb   : > { %518 = vmatprep.mubr.f32.mxu0 %v360_v58 }
  0xbe   : > { %519 = vmatmul.mubr.f32.gmra.mxu0 %v359_v59 }
  0xbf   : > { %523 = vmatprep.mubr.f32.mxu0 %v362_v60 }
  0xc2   : > { %524 = vmatmul.mubr.f32.gmra.mxu0 %v361_v61 }
  0xc3   : > { %528 = vmatprep.mubr.f32.mxu0 %v364_v62 }
  0xc6   : > { %529 = vmatmul.mubr.f32.gmra.mxu0 %v363_v63  ;;  %v566_v63 = vld [vmem:[%s1601_s15 + $0x38] sm:$0xff] }
  0xc7   : > { %533 = vmatprep.mubr.f32.mxu0 %v366_v0 }
  0xca   : > { %534 = vmatmul.mubr.f32.gmra.mxu0 %v365_v1 }
  0xcb   : > { %538 = vmatprep.mubr.f32.mxu0 %v368_v2 }
  0xce   : > { %539 = vmatmul.mubr.f32.gmra.mxu0 %v367_v3 }
  0xcf   : > { %543 = vmatprep.mubr.f32.mxu0 %v370_v4 }
  0xd2   : > { %544 = vmatmul.mubr.f32.gmra.mxu0 %v369_v5  ;;  %v567_v5 = vld [vmem:[%s1601_s15 + $0x40] sm:$0xff] }
  0xd3   : > { %548 = vmatprep.mubr.f32.mxu0 %v372_v6 }
  0xd6   : > { %549 = vmatmul.mubr.f32.gmra.mxu0 %v371_v7 }
  0xd7   : > { %553 = vmatprep.mubr.f32.mxu0 %v374_v8 }
  0xda   : > { %554 = vmatmul.mubr.f32.gmra.mxu0 %v373_v9 }
 0x15e   : > { %v965_v16 = vpop.f32.mrf.mxu0 }
 0x160   : > { %v966_v17 = vpop.f32.mrf.mxu0 }
 0x161   : > { %v967_v19 = vadd.f32 %v966_v17, %v965_v16  ;;  %v569_v17 = vld [vmem:[%s1601_s15 + $0x50] sm:$0xff] }
 0x162   : > { %v968_v20 = vpop.f32.mrf.mxu0 }
 0x163   : > { %v481_v22 = vadd.f32 %v967_v19, %v1658_v18 }
 0x164   : > { %v969_v23 = vpop.f32.mrf.mxu0 }
 0x165   : > { %v970_v24 = vadd.f32 %v969_v23, %v968_v20  ;;  %v575_v25 = vmul.f32 %v559_v21, %v481_v22 }
 0x166   : > { %v971_v26 = vpop.f32.mrf.mxu0 }
 0x167   : > { %v486_v28 = vadd.f32 %v970_v24, %v1658_v18  ;;  %1077 = vmatprep.mubr.f32.mxu1 %v575_v25  ;;  %v570_v24 = vld [vmem:[%s1601_s15 + $0x58] sm:$0xff] }
 0x168   : > { %v972_v29 = vpop.f32.mrf.mxu0 }
 0x169   : > { %v973_v30 = vadd.f32 %v972_v29, %v971_v26  ;;  %v576_v31 = vmul.f32 %v560_v27, %v486_v28 }
 0x16a   : > { %v974_v32 = vpop.f32.mrf.mxu0 }
 0x16b   : > { %v491_v34 = vadd.f32 %v973_v30, %v1658_v18  ;;  %1078 = vmatmul.mubr.f32.vlgmr.msra.gmra.mxu1 %v576_v31  ;;  %v571_v30 = vld [vmem:[%s1601_s15 + $0x60] sm:$0xff] }
 0x16c   : > { %v975_v35 = vpop.f32.mrf.mxu0 }
 0x16d   : > { %v976_v36 = vadd.f32 %v975_v35, %v974_v32  ;;  %v577_v37 = vmul.f32 %v561_v33, %v491_v34 }
 0x16e   : > { %v977_v38 = vpop.f32.mrf.mxu0 }
 0x16f   : > { %v496_v40 = vadd.f32 %v976_v36, %v1658_v18  ;;  %1080 = vmatprep.mubr.f32.mxu1 %v577_v37  ;;  %v572_v36 = vld [vmem:[%s1601_s15 + $0x68] sm:$0xff] }
 0x170   : > { %v978_v41 = vpop.f32.mrf.mxu0 }
 0x171   : > { %v979_v42 = vadd.f32 %v978_v41, %v977_v38  ;;  %v578_v43 = vmul.f32 %v562_v39, %v496_v40 }
 0x172   : > { %v980_v44 = vpop.f32.mrf.mxu0 }
 0x173   : > { %v501_v46 = vadd.f32 %v979_v42, %v1658_v18  ;;  %1081 = vmatmul.mubr.f32.gmra.mxu1 %v578_v43  ;;  %v573_v42 = vld [vmem:[%s1601_s15 + $0x70] sm:$0xff] }
 0x174   : > { %v981_v47 = vpop.f32.mrf.mxu0 }
 0x175   : > { %v982_v48 = vadd.f32 %v981_v47, %v980_v44  ;;  %v579_v49 = vmul.f32 %v563_v45, %v501_v46  ;;  %v574_v47 = vld [vmem:[%s1601_s15 + $0x78] sm:$0xff]  ;;  %s1293_s15 = scalar_lea.vmem %s1292_s12, 4096 }
 0x176   : > { %v983_v50 = vpop.f32.mrf.mxu0  ;;  %p1295_p13 = scmp.lt.s32.totalorder %s1293_s15, %s1287_s10 }
 0x177   : > { %v506_v52 = vadd.f32 %v982_v48, %v1658_v18  ;;  %1083 = vmatprep.mubr.f32.mxu1 %v579_v49 }
 0x178   : > { %v984_v53 = vpop.f32.mrf.mxu0  ;;  %p1296_p1 = por %p1295_p13, %p1294_p9 }
 0x179   : > { %v985_v54 = vadd.f32 %v984_v53, %v983_v50  ;;  %v580_v55 = vmul.f32 %v564_v51, %v506_v52  ;;  %v923_v50 = vld [vmem:[%s1770_s5] ss:$0 sm:$0xff] }
 0x17a   : > { %v986_v56 = vpop.f32.mrf.mxu0  ;;  %p1297_p4 = pnand %p1296_p1, %p1290_p11 }
 0x17b   : > { %v511_v58 = vadd.f32 %v985_v54, %v1658_v18  ;;  %1084 = vmatmul.mubr.f32.gmra.mxu1 %v580_v55 }
 0x17c   : > { %v987_v59 = vpop.f32.mrf.mxu0 }
 0x17d   : > { %v988_v60 = vadd.f32 %v987_v59, %v986_v56  ;;  %v581_v61 = vmul.f32 %v565_v57, %v511_v58 }
 0x17e   : > { %v989_v62 = vpop.f32.mrf.mxu0 }
 0x17f   : > { %v516_v0 = vadd.f32 %v988_v60, %v1658_v18  ;;  %1086 = vmatprep.mubr.f32.mxu1 %v581_v61 }
 0x180   : > { %v990_v1 = vpop.f32.mrf.mxu0 }
 0x181   : > { %v991_v2 = vadd.f32 %v990_v1, %v989_v62  ;;  %v582_v3 = vmul.f32 %v566_v63, %v516_v0 }
 0x182   : > { %v992_v4 = vpop.f32.mrf.mxu0 }
 0x183   : > { %v521_v6 = vadd.f32 %v991_v2, %v1658_v18  ;;  %1087 = vmatmul.mubr.f32.gmra.mxu1 %v582_v3 }
 0x184   : > { %v993_v7 = vpop.f32.mrf.mxu0 }
 0x185   : > { %v994_v8 = vadd.f32 %v993_v7, %v992_v4  ;;  %v583_v9 = vmul.f32 %v567_v5, %v521_v6 }
 0x186   : > { %v995_v10 = vpop.f32.mrf.mxu0 }
 0x187   : > { %v526_v12 = vadd.f32 %v994_v8, %v1658_v18  ;;  %1089 = vmatprep.mubr.f32.mxu1 %v583_v9 }
 0x188   : > { %v996_v13 = vpop.f32.mrf.mxu0 }
 0x189   : > { %v997_v14 = vadd.f32 %v996_v13, %v995_v10  ;;  %v584_v15 = vmul.f32 %v568_v11, %v526_v12 }
 0x18a   : > { %v998_v16 = vpop.f32.mrf.mxu0 }
 0x18b   : > { %v531_v19 = vadd.f32 %v997_v14, %v1658_v18  ;;  %1090 = vmatmul.mubr.f32.gmra.mxu1 %v584_v15 }
 0x18c   : > { %v999_v20 = vpop.f32.mrf.mxu0 }
 0x18d   : > { %v1000_v21 = vadd.f32 %v999_v20, %v998_v16  ;;  %v585_v22 = vmul.f32 %v569_v17, %v531_v19 }
 0x18e   : > { %v1001_v23 = vpop.f32.mrf.mxu0 }
 0x18f   : > { %v536_v25 = vadd.f32 %v1000_v21, %v1658_v18  ;;  %1092 = vmatprep.mubr.f32.mxu1 %v585_v22 }
 0x190   : > { %v1002_v26 = vpop.f32.mrf.mxu0 }
 0x191   : > { %v1003_v27 = vadd.f32 %v1002_v26, %v1001_v23  ;;  %v586_v28 = vmul.f32 %v570_v24, %v536_v25 }
 0x192   : > { %v1004_v29 = vpop.f32.mrf.mxu0 }
 0x193   : > { %v541_v31 = vadd.f32 %v1003_v27, %v1658_v18  ;;  %1093 = vmatmul.mubr.f32.gmra.mxu1 %v586_v28 }
 0x194   : > { %v1005_v32 = vpop.f32.mrf.mxu0 }
 0x195   : > { %v1006_v33 = vadd.f32 %v1005_v32, %v1004_v29  ;;  %v587_v34 = vmul.f32 %v571_v30, %v541_v31 }
 0x196   : > { %v1007_v35 = vpop.f32.mrf.mxu0 }
 0x197   : > { %v546_v37 = vadd.f32 %v1006_v33, %v1658_v18  ;;  %1095 = vmatprep.mubr.f32.mxu1 %v587_v34 }
 0x198   : > { %v1008_v38 = vpop.f32.mrf.mxu0 }
 0x199   : > { %v1009_v39 = vadd.f32 %v1008_v38, %v1007_v35  ;;  %v588_v40 = vmul.f32 %v572_v36, %v546_v37 }
 0x19a   : > { %v1010_v41 = vpop.f32.mrf.mxu0 }
 0x19b   : > { %v551_v43 = vadd.f32 %v1009_v39, %v1658_v18  ;;  %1096 = vmatmul.mubr.f32.gmra.mxu1 %v588_v40 }
 0x19c   : > { %v1011_v44 = vpop.f32.mrf.mxu0 }
 0x19d   : > { %v1012_v45 = vadd.f32 %v1011_v44, %v1010_v41  ;;  %v589_v46 = vmul.f32 %v573_v42, %v551_v43 }
 0x19f   : > { %v556_v48 = vadd.f32 %v1012_v45, %v1658_v18  ;;  %1098 = vmatprep.mubr.f32.mxu1 %v589_v46 }
 0x1a1   : > { %v590_v49 = vmul.f32 %v574_v47, %v556_v48 }
 0x1a3   : > { %1099 = vmatmul.mubr.f32.gmra.mxu1 %v590_v49 }
 0x22b   : > { %v1079_v51 = vpop.f32.mrf.mxu1 }
 0x22c   : > { %v686_v52 = vadd.f32 %v1079_v51, %v923_v50 }
 0x22d   : > { %v680_v53 = vpop.f32.mrf.mxu1 }
 0x22e   : > { %760 = vst [vmem:[%s1697_s13 + $0x8] sm:$0xff] %v686_v52  ;;  %v681_v18 = vadd.f32 %v923_v50, %v680_v53 }
 0x230   : > { %759 = vst [vmem:[%s1697_s13] sm:$0xff] %v681_v18 }
 0x233   : > { %v1082_v54 = vpop.f32.mrf.mxu1 }
 0x234   : > { %v696_v55 = vadd.f32 %v1082_v54, %v923_v50 }
 0x235   : > { %v690_v56 = vpop.f32.mrf.mxu1 }
 0x236   : > { %762 = vst [vmem:[%s1697_s13 + $0x18] sm:$0xff] %v696_v55  ;;  %v691_v57 = vadd.f32 %v923_v50, %v690_v56 }
 0x238   : > { %761 = vst [vmem:[%s1697_s13 + $0x10] sm:$0xff] %v691_v57 }
 0x23b   : > { %v1085_v58 = vpop.f32.mrf.mxu1 }
 0x23c   : > { %v706_v59 = vadd.f32 %v1085_v58, %v923_v50 }
 0x23d   : > { %v700_v60 = vpop.f32.mrf.mxu1 }
 0x23e   : > { %764 = vst [vmem:[%s1697_s13 + $0x28] sm:$0xff] %v706_v59  ;;  %v701_v61 = vadd.f32 %v923_v50, %v700_v60 }
 0x240   : > { %763 = vst [vmem:[%s1697_s13 + $0x20] sm:$0xff] %v701_v61 }
 0x243   : > { %v1088_v62 = vpop.f32.mrf.mxu1 }
 0x244   : > { %v716_v63 = vadd.f32 %v1088_v62, %v923_v50 }
 0x245   : > { %v710_v0 = vpop.f32.mrf.mxu1 }
 0x246   : > { %766 = vst [vmem:[%s1697_s13 + $0x38] sm:$0xff] %v716_v63  ;;  %v711_v1 = vadd.f32 %v923_v50, %v710_v0 }
 0x248   : > { %765 = vst [vmem:[%s1697_s13 + $0x30] sm:$0xff] %v711_v1 }
 0x24b   : > { %v1091_v2 = vpop.f32.mrf.mxu1 }
 0x24c   : > { %v726_v3 = vadd.f32 %v1091_v2, %v923_v50 }
 0x24d   : > { %v720_v4 = vpop.f32.mrf.mxu1 }
 0x24e   : > { %768 = vst [vmem:[%s1697_s13 + $0x48] sm:$0xff] %v726_v3  ;;  %v721_v5 = vadd.f32 %v923_v50, %v720_v4 }
 0x250   : > { %767 = vst [vmem:[%s1697_s13 + $0x40] sm:$0xff] %v721_v5 }
 0x253   : > { %v1094_v6 = vpop.f32.mrf.mxu1 }
 0x254   : > { %v736_v7 = vadd.f32 %v1094_v6, %v923_v50 }
 0x255   : > { %v730_v8 = vpop.f32.mrf.mxu1 }
 0x256   : > { %770 = vst [vmem:[%s1697_s13 + $0x58] sm:$0xff] %v736_v7  ;;  %v731_v9 = vadd.f32 %v923_v50, %v730_v8 }
 0x258   : > { %769 = vst [vmem:[%s1697_s13 + $0x50] sm:$0xff] %v731_v9 }
 0x25b   : > { %v1097_v10 = vpop.f32.mrf.mxu1 }
 0x25c   : > { %v746_v11 = vadd.f32 %v1097_v10, %v923_v50 }
 0x25d   : > { %v740_v12 = vpop.f32.mrf.mxu1 }
 0x25e   : > { %772 = vst [vmem:[%s1697_s13 + $0x68] sm:$0xff] %v746_v11  ;;  %v741_v13 = vadd.f32 %v923_v50, %v740_v12 }
 0x260   : > { %771 = vst [vmem:[%s1697_s13 + $0x60] sm:$0xff] %v741_v13 }
 0x263   : > { %v1100_v14 = vpop.f32.mrf.mxu1 }
 0x264   : > { %v756_v15 = vadd.f32 %v1100_v14, %v923_v50 }
 0x265   : > { %v750_v16 = vpop.f32.mrf.mxu1 }
 0x266   : > { %774 = vst [vmem:[%s1697_s13 + $0x78] sm:$0xff] %v756_v15  ;;  %v751_v17 = vadd.f32 %v923_v50, %v750_v16 }
 0x268   : > { %773 = vst [vmem:[%s1697_s13 + $0x70] sm:$0xff] %v751_v17 }
 0x269   : > { %1300 = shalt.err (!%p1297_p4)
}
 0x26a   : > { %s1301_s0 = scalar_lea.hbm %s1718_s7, 2048  ;;  %s1305_s18 = scalar_lea.hbm %s1771_s6, 4096 }
 0x26b   : > { %p1302_p5 = scmp.ne.s32.totalorder %s1718_s7, %s1301_s0  ;;  %p1306_p2 = scmp.lt.s32.totalorder %s1718_s7, %s1771_s6 }
 0x26c   : > { %p1307_p6 = scmp.lt.s32.totalorder %s1305_s18, %s1301_s0 }
 0x26d   : > { %p1303_p7 = pnand %p1302_p5, %p1799_p10 }
 0x26e   : > { %p1308_p12 = por %p1307_p6, %p1306_p2 }
 0x26f   : > { %p1304_p8 = pneg %p1303_p7 }
 0x271   : > { %p1309_p0 = pnand %p1308_p12, %p1304_p8 }
 0x273   : > { %1312 = shalt.err (!%p1309_p0)
}
 0x274   : > { %s1374_s8 = smov 128   ;;  %s1375_s17 = smov 8  }
 0x275   : > { %1113 = dma.vmem_to_hbm [thread:$0]  (%p1799_p10), %s1720_s11, 2048, %s1718_s7, %s776_s20, %s1374_s8, %s1374_s8, %s1375_s17  }
 0x276 PF: > { %s804_s13 = sand.u32 1, %s1351_s21   ;;  %p1800_p3 = scmp.ne.s32.totalorder %s1781_s28, 0 }
 0x277   : > { %p1801_p11 = scmp.ge.s32.totalorder %s1363_s24, 2  ;;  %s805_s2 = scalar_lea.sflag [#allocation4], %s804_s13 }
 0x279   : > { %p1130_p9 = pnand %p1801_p11, %p1800_p3 }
 0x27b   : > { %p1131_p13 = pneg %p1130_p9 }
 0x27d   : > { %1346 = dma.done.wait (%p1131_p13), %s805_s2, 2048  }
 0x27e   : > { %1348 = vsyncadd (%p1131_p13), %s805_s2, 4294965248  ;;  %s1802_s14 = sld [smem:[#allocation16_spill]]  ;;  %p23_p1 = scmp.ge.s32.totalorder %s1489_s19, 4  }
 0x27f   : > { %s1803_s21 = smov %s1355_s22  ;;  %s1804_s22 = smov %s1359_s23 }
 0x280   : > { %s1806_s24 = smov %s1489_s19  ;;  %25 = sbr.rel (!%p23_p1) target bundleno = 12 (0xc), region = 110 }
 0x284   : > { %s1805_s23 = smov %s1802_s14 }
 0x285   :  { %810 = vsyncpa [#allocation3], 1 }
 0x286   :  { %812 = vsyncpa [#allocation3 + $0x1], 1 }
 0x287   :  { %813 = vsyncpa [#allocation6], 1 }
 0x288   :  { %815 = vsyncpa [#allocation6 + $0x1], 1 }
 0x289   :  { %816 = vsyncpa [#allocation9], 1 }
 0x28a   :  { %817 = vsyncpa [#allocation4], 1 }
 0x28b   :  { %819 = vsyncpa [#allocation4 + $0x1], 1 }

</bundles_post_ra>
